<compile_context>
chip_gen: v7x
topology: tpu7x:2x2x1
jax: 0.10.0
libtpu: 0.0.40
codegen_flags: <defaults>
</compile_context>

<pallas_src>
import jax
import jax.numpy as jnp
from jax.experimental import pallas as pl
from jax.experimental.pallas import tpu as pltpu

LANE = 128
CHUNK_ROWS = 128          # inner-loop chunk: 16 vregs per input per iteration
TILE_ROWS = 8192          # 8192 x 128 f32 = 4 MiB per input per pipeline buffer


def _round_up(x, m):
    return ((x + m - 1) // m) * m


def _make_kernel(block_rows, n_inner, rows, edge_start):
    """Build the kernel.

    edge_start: smallest global block index whose rows need masking (ragged
    last block and/or the clamped overhang step of the 2-way split), or None
    if every block is full.
    """
    n_chunks = block_rows // CHUNK_ROWS

    def kernel(t_ref, p_ref, o_ref):
        c = pl.program_id(0)
        i = pl.program_id(1)
        block_idx = c * n_inner + i

        @pl.when(i == 0)
        def _():
            o_ref[...] = jnp.zeros_like(o_ref)

        def accumulate(apply_mask):
            def chunk_fn(j, carry):
                r0 = pl.multiple_of(j * CHUNK_ROWS, CHUNK_ROWS)
                # Upcast after the load: bf16 inputs stay 2 B/elem in HBM.
                t = t_ref[pl.ds(r0, CHUNK_ROWS), :].astype(jnp.float32)
                p = p_ref[pl.ds(r0, CHUNK_ROWS), :].astype(jnp.float32)
                a = jnp.abs(t - p)
                contrib = a * a + a              # (t-p)^2 + |t-p|
                if apply_mask:
                    # Rows at/after `limit` are out-of-bounds garbage (ragged
                    # last block or the fully-masked overhang step).
                    limit = rows - (block_idx * block_rows + r0)
                    row_ids = jax.lax.broadcasted_iota(
                        jnp.int32, contrib.shape, 0)
                    contrib = jnp.where(row_ids < limit, contrib, 0.0)
                # Layout-preserving sublane-group reshape + VPU tree-add into
                # a single (8, LANE) accumulator vreg.
                return carry + contrib.reshape(
                    CHUNK_ROWS // 8, 8, LANE).sum(axis=0)

            partial = jax.lax.fori_loop(
                0, n_chunks, chunk_fn, jnp.zeros((8, LANE), jnp.float32))
            o_ref[...] += partial

        if edge_start is None:
            accumulate(False)
        elif edge_start <= 0:
            accumulate(True)
        else:
            @pl.when(block_idx < edge_start)
            def _():
                accumulate(False)

            @pl.when(block_idx >= edge_start)
            def _():
                accumulate(True)

    return kernel


def l1_l2_loss(target, pred, *, tile_rows=TILE_ROWS):
    assert target.shape == pred.shape
    n_elems = target.size
    assert n_elems > 0

    t_flat = jnp.ravel(target)
    p_flat = jnp.ravel(pred)

    inv_n = 1.0 / float(n_elems)   # exact reciprocal in Python double precision

    # Any <128-element tail is summed in plain JAX: avoids a full jnp.pad copy
    # for non-lane-aligned shapes; zero extra cost on the aligned fast path.
    n_main = (n_elems // LANE) * LANE
    if n_main != n_elems:
        td = (t_flat[n_main:].astype(jnp.float32)
              - p_flat[n_main:].astype(jnp.float32))
        ta = jnp.abs(td)
        tail_sum = jnp.sum(ta * ta + ta)
    else:
        tail_sum = jnp.float32(0.0)

    if n_main == 0:                       # tiny input: no lane-aligned prefix
        return (tail_sum * inv_n).astype(jnp.float32)

    rows = n_main // LANE
    t2 = t_flat[:n_main].reshape(rows, LANE)
    p2 = p_flat[:n_main].reshape(rows, LANE)

    # Block rows: multiple of CHUNK_ROWS so the in-kernel chunk loop tiles it
    # exactly; may over-run `rows` for small inputs (those rows are masked).
    block_rows = min(_round_up(max(tile_rows, 1), CHUNK_ROWS),
                     _round_up(rows, CHUNK_ROWS))
    total_blocks = pl.cdiv(rows, block_rows)

    # Outer "parallel" axis: split the block range in two whenever there is
    # more than one block so v7x's two TensorCores each stream half of HBM
    # (harmless serial loop on v5e/v6e).  Odd block counts produce a single
    # overhang step whose index_map is clamped and whose rows are fully masked.
    # TODO(synk): verify in an xprof trace that "parallel" shards the outer
    # axis across v7x's 2 TCs; if not, switch it to pltpu.CORE_PARALLEL.
    n_outer = 2 if total_blocks >= 2 else 1
    n_inner = pl.cdiv(total_blocks, n_outer)
    has_overhang = (n_outer * n_inner) != total_blocks

    if rows % block_rows != 0:
        edge_start = total_blocks - 1   # ragged last block (+ any overhang)
    elif has_overhang:
        edge_start = total_blocks       # only the clamped overhang step
    else:
        edge_start = None

    kernel = _make_kernel(block_rows, n_inner, rows, edge_start)

    last_block = total_blocks - 1
    in_spec = pl.BlockSpec(
        (block_rows, LANE),
        lambda c, i: (jnp.minimum(c * n_inner + i, last_block), 0))

    itemsize = jnp.dtype(t2.dtype).itemsize
    # 2 inputs x 2 pipeline buffers of one block, plus generous headroom
    # (v5e's default scoped VMEM limit is only 16 MiB).
    vmem_limit = int(2 * 2 * block_rows * LANE * itemsize + (8 << 20))

    cost = pl.CostEstimate(
        flops=5 * n_main,
        transcendentals=0,
        bytes_accessed=2 * itemsize * n_main + 4 * n_outer * 8 * LANE,
    )

    partials = pl.pallas_call(
        kernel,
        out_shape=jax.ShapeDtypeStruct((n_outer * 8, LANE), jnp.float32),
        grid_spec=pltpu.PrefetchScalarGridSpec(
            num_scalar_prefetch=0,
            grid=(n_outer, n_inner),
            in_specs=[in_spec, in_spec],
            out_specs=pl.BlockSpec((8, LANE), lambda c, i: (c, 0)),
        ),
        compiler_params=pltpu.CompilerParams(
            dimension_semantics=("parallel", "arbitrary"),
            vmem_limit_bytes=vmem_limit),
        cost_estimate=cost,
    )(t2, p2)

    total = jnp.sum(partials) + tail_sum
    return (total * inv_n).astype(jnp.float32)


def _ref_loss(target, pred):
    diff = target - pred
    return jnp.mean(diff * diff + jnp.abs(diff))


if __name__ == "__main__":
    key = jax.random.PRNGKey(0)
    k1, k2, k3, k4, k5, k6, k7, k8 = jax.random.split(key, 8)

    # Primary example (NCHW, small): single masked block (rows=16 < 128).
    shape = (2, 4, 16, 16)
    target = jax.random.normal(k1, shape, dtype=jnp.float32)
    pred = jax.random.normal(k2, shape, dtype=jnp.float32)
    loss = l1_l2_loss(target, pred)
    jax.block_until_ready(loss)
    ref = _ref_loss(target, pred)
    assert jnp.allclose(loss, ref, rtol=1e-5, atol=1e-6), (loss, ref)

    # 2-way outer split with an odd block count (overhang clamp + full mask)
    # and a ragged last block: rows = 296 -> 3 blocks of 128 rows.
    shape2 = (2, 4, 37, 128)
    t2 = jax.random.normal(k3, shape2, dtype=jnp.float32)
    p2 = jax.random.normal(k4, shape2, dtype=jnp.float32)
    loss2 = l1_l2_loss(t2, p2, tile_rows=128)
    jax.block_until_ready(loss2)
    ref2 = _ref_loss(t2, p2)
    assert jnp.allclose(loss2, ref2, rtol=1e-5, atol=1e-6), (loss2, ref2)

    # Non-lane-aligned element count: plain-JAX tail path + masked block.
    shape3 = (3, 5, 7, 11)      # 1155 elements -> 9 full lanes + 3-elem tail
    t3 = jax.random.normal(k5, shape3, dtype=jnp.float32)
    p3 = jax.random.normal(k6, shape3, dtype=jnp.float32)
    loss3 = l1_l2_loss(t3, p3)
    jax.block_until_ready(loss3)
    ref3 = _ref_loss(t3, p3)
    assert jnp.allclose(loss3, ref3, rtol=1e-5, atol=1e-6), (loss3, ref3)

    # Clean path: even block count, no ragged rows, no overhang, no masking.
    shape4 = (2, 4, 64, 128)    # rows = 512 -> 2 full blocks of 256 rows
    t4 = jax.random.normal(k7, shape4, dtype=jnp.float32)
    p4 = jax.random.normal(k8, shape4, dtype=jnp.float32)
    loss4 = l1_l2_loss(t4, p4, tile_rows=256)
    jax.block_until_ready(loss4)
    ref4 = _ref_loss(t4, p4)
    assert jnp.allclose(loss4, ref4, rtol=1e-5, atol=1e-6), (loss4, ref4)

    print("KERNEL_OK")
</pallas_src>

<mosaic_0001>
module attributes {stable_mosaic.version = 11 : i64} {
  func.func @kernel(%arg0: i32, %arg1: i32, %arg2: memref<128x128xf32, #tpu.memory_space<vmem>>, %arg3: memref<128x128xf32, #tpu.memory_space<vmem>>, %arg4: memref<8x128xf32, #tpu.memory_space<vmem>>) attributes {dimension_semantics = [#tpu.dimension_semantics<parallel>, #tpu.dimension_semantics<arbitrary>], iteration_bounds = array<i64: 1, 1>, scalar_prefetch = 0 : i64, scratch_operands = 0 : i64, tpu.core_type = #tpu.core_type<tc>, window_params = [{transform_indices = @transform_0, window_bounds = array<i64: 128, 128>}, {transform_indices = @transform_1, window_bounds = array<i64: 128, 128>}, {transform_indices = @transform_2, window_bounds = array<i64: 8, 128>}]} {
    %c1_i32 = arith.constant 1 : i32
    %0 = arith.muli %arg0, %c1_i32 : i32
    %1 = arith.addi %0, %arg1 : i32
    %c0_i32 = arith.constant 0 : i32
    %2 = arith.cmpi eq, %arg1, %c0_i32 : i32
    %3 = arith.extui %2 : i1 to i32
    %c0_i32_0 = arith.constant 0 : i32
    %4 = arith.cmpi ne, %3, %c0_i32_0 : i32
    scf.if %4 {
      %cst_11 = arith.constant 0.000000e+00 : f32
      %30 = vector.broadcast %cst_11 : f32 to vector<8x128xf32>
      %c0_12 = arith.constant 0 : index
      %c0_13 = arith.constant 0 : index
      %31 = vector.load %arg4[%c0_12, %c0_13] : memref<8x128xf32, #tpu.memory_space<vmem>>, vector<8x128xf32>
      tpu.vector_store %arg4[%c0_12, %c0_13], %30 {strides = array<i32>} : memref<8x128xf32, #tpu.memory_space<vmem>>, vector<8x128xf32>,
    } else {
    }
    %cst = arith.constant 0.000000e+00 : f32
    %5 = vector.broadcast %cst : f32 to vector<8x128xf32>
    %c0_i32_1 = arith.constant 0 : i32
    %c128_i32 = arith.constant 128 : i32
    %6 = arith.muli %c0_i32_1, %c128_i32 : i32
    %7 = tpu.assume_multiple %6, 128 : i32
    %8 = arith.index_cast %7 : i32 to index
    %c0 = arith.constant 0 : index
    %9 = vector.load %arg2[%8, %c0] : memref<128x128xf32, #tpu.memory_space<vmem>>, vector<128x128xf32>
    %10 = arith.index_cast %7 : i32 to index
    %c0_2 = arith.constant 0 : index
    %11 = vector.load %arg3[%10, %c0_2] : memref<128x128xf32, #tpu.memory_space<vmem>>, vector<128x128xf32>
    %12 = arith.subf %9, %11 : vector<128x128xf32>
    %13 = math.absf %12 : vector<128x128xf32>
    %14 = arith.mulf %13, %13 : vector<128x128xf32>
    %15 = arith.addf %14, %13 : vector<128x128xf32>
    %c128_i32_3 = arith.constant 128 : i32
    %16 = arith.muli %1, %c128_i32_3 : i32
    %17 = arith.addi %16, %7 : i32
    %c16_i32 = arith.constant 16 : i32
    %18 = arith.subi %c16_i32, %17 : i32
    %19 = tpu.iota {dimensions = array<i32: 0>} : vector<128x128xi32>
    %20 = vector.broadcast %18 : i32 to vector<128x128xi32>
    %21 = arith.cmpi slt, %19, %20 : vector<128x128xi32>
    %cst_4 = arith.constant 0.000000e+00 : f32
    %22 = vector.broadcast %cst_4 : f32 to vector<128x128xf32>
    %23 = arith.select %21, %15, %22 : vector<128x128xi1>, vector<128x128xf32>
    %24 = vector.shape_cast %23 : vector<128x128xf32> to vector<16x8x128xf32>
    %cst_5 = arith.constant dense<0.000000e+00> : vector<8x128xf32>
    %25 = vector.multi_reduction <add>, %24, %cst_5 [0] : vector<16x8x128xf32> to vector<8x128xf32>
    %26 = arith.addf %5, %25 : vector<8x128xf32>
    %c1_i32_6 = arith.constant 1 : i32
    %c0_7 = arith.constant 0 : index
    %c0_8 = arith.constant 0 : index
    %27 = vector.load %arg4[%c0_7, %c0_8] : memref<8x128xf32, #tpu.memory_space<vmem>>, vector<8x128xf32>
    %28 = arith.addf %27, %26 : vector<8x128xf32>
    %c0_9 = arith.constant 0 : index
    %c0_10 = arith.constant 0 : index
    %29 = vector.load %arg4[%c0_9, %c0_10] : memref<8x128xf32, #tpu.memory_space<vmem>>, vector<8x128xf32>
    tpu.vector_store %arg4[%c0_9, %c0_10], %28 {strides = array<i32>} : memref<8x128xf32, #tpu.memory_space<vmem>>, vector<8x128xf32>,
    return
  }
  func.func @transform_0(%arg0: i32, %arg1: i32) -> (i32, i32) {
    %c1_i32 = arith.constant 1 : i32
    %0 = arith.muli %arg0, %c1_i32 : i32
    %1 = arith.addi %0, %arg1 : i32
    %c0_i32 = arith.constant 0 : i32
    %2 = arith.minsi %1, %c0_i32 : i32
    %c0_i32_0 = arith.constant 0 : i32
    %c0_i32_1 = arith.constant 0 : i32
    return %2, %c0_i32_0 : i32, i32
  }
  func.func @transform_1(%arg0: i32, %arg1: i32) -> (i32, i32) {
    %c1_i32 = arith.constant 1 : i32
    %0 = arith.muli %arg0, %c1_i32 : i32
    %1 = arith.addi %0, %arg1 : i32
    %c0_i32 = arith.constant 0 : i32
    %2 = arith.minsi %1, %c0_i32 : i32
    %c0_i32_0 = arith.constant 0 : i32
    %c0_i32_1 = arith.constant 0 : i32
    return %2, %c0_i32_0 : i32, i32
  }
  func.func @transform_2(%arg0: i32, %arg1: i32) -> (i32, i32) {
    %c0_i32 = arith.constant 0 : i32
    %c0_i32_0 = arith.constant 0 : i32
    return %arg0, %c0_i32 : i32, i32
  }
}

</mosaic_0001>

<bundles_post_ra>
// kernel: tpu_custom_call.1
= control target key start
LH: loop header
LB: loop body
LE: loop exit
PB: predicated region body
PF: predicated region fallthrough
CT: control target
= control target key end

     0   :  { %7 = vsyncpa [#allocation3], 0  ;;  %s400_s0 = inlined_call_operand.hbm [shape: f32[16,128], index: 0, kind: input, shape index: {}]   ;;  %s401_s1 = inlined_call_operand.hbm [shape: f32[16,128], index: 1, kind: input, shape index: {}]   ;;  %s402_s2 = inlined_call_operand.hbm [shape: f32[8,128], index: 2, kind: output, shape index: {}]  }
   0x1   :  { %8 = vsyncpa [#allocation6], 0 }
   0x2   :  { %9 = vsyncpa [#allocation4], 0 }
   0x3   :  { %20 = vsyncadd [#allocation3], 1792  ;;  %s344_s9 = smov [#allocation2]   ;;  %s272_s13 = scalar_lea.hbm %s400_s0, 256 }
   0x4   :  { %s25_s10 = sshll.u32 %s344_s9, 4  ;;  %p273_p0 = scmp.ne.s32.totalorder %s400_s0, %s272_s13  ;;  %s26_s10 = int_to_ptr.vmem [resolvable:$true] %s25_s10 }
   0x5   :  { %p276_p1 = scmp.lt.u32.totalorder %s272_s13, %s400_s0 }
   0x7   :  { %p278_p2 = pnand %p276_p1, %p273_p0 }
   0x9   :  { %281 = shalt.err (!%p278_p2)
}
   0xa   :  { %s282_s18 = scalar_lea.vmem %s26_s10, 256  ;;  %s286_s19 = scalar_lea.vmem %s26_s10, 2048 }
   0xb   :  { %p283_p3 = scmp.ne.s32.totalorder %s26_s10, %s282_s18  ;;  %p287_p4 = scmp.lt.s32.totalorder %s26_s10, %s26_s10 }
   0xc   :  { %p288_p5 = scmp.lt.s32.totalorder %s286_s19, %s282_s18 }
   0xe   :  { %p289_p6 = por %p288_p5, %p287_p4 }
  0x10   :  { %p290_p7 = pnand %p289_p6, %p283_p3 }
  0x12   :  { %293 = shalt.err (!%p290_p7)
}
  0x13   :  { %s345_s20 = smov 128   ;;  %s346_s21 = smov 8  }
  0x14   :  { %31 = dma.hbm_to_vmem [thread:$0]  %s400_s0, 256, %s26_s10, [#allocation3], %s345_s20, %s345_s20, %s346_s21  }
  0x15   :  { %42 = vsyncadd [#allocation6], 1792  ;;  %s347_s24 = smov [#allocation5]   ;;  %s294_s28 = scalar_lea.hbm %s401_s1, 256 }
  0x16   :  { %s47_s25 = sshll.u32 %s347_s24, 4  ;;  %p295_p8 = scmp.ne.s32.totalorder %s401_s1, %s294_s28  ;;  %s48_s25 = int_to_ptr.vmem [resolvable:$true] %s47_s25 }
  0x17   :  { %p298_p9 = scmp.lt.u32.totalorder %s294_s28, %s401_s1 }
  0x19   :  { %p300_p10 = pnand %p298_p9, %p295_p8 }
  0x1b   :  { %303 = shalt.err (!%p300_p10)
}
  0x1c   :  { %s304_s5 = scalar_lea.vmem %s48_s25, 256  ;;  %s308_s0 = scalar_lea.vmem %s48_s25, 2048 }
  0x1d   :  { %p305_p11 = scmp.ne.s32.totalorder %s48_s25, %s304_s5  ;;  %p309_p12 = scmp.lt.s32.totalorder %s48_s25, %s48_s25 }
  0x1e   :  { %p310_p13 = scmp.lt.s32.totalorder %s308_s0, %s304_s5 }
  0x20   :  { %p311_p0 = por %p310_p13, %p309_p12 }
  0x22   :  { %p312_p1 = pnand %p311_p0, %p305_p11 }
  0x24   :  { %315 = shalt.err (!%p312_p1)
}
  0x25   :  { %53 = dma.hbm_to_vmem [thread:$0]  %s401_s1, 256, %s48_s25, [#allocation6], %s345_s20, %s345_s20, %s346_s21  }
  0x26   :  { %338 = dma.done.wait [#allocation3], 2048  }
  0x27   :  { %339 = vsyncadd [#allocation3], 4294965248 }
  0x28   :  { %340 = dma.done.wait [#allocation6], 2048  }
  0x29   :  { %341 = vsyncadd [#allocation6], 4294965248  ;;  %v78_v0 = vld [vmem:[#allocation2] sm:$0xff]  ;;  %v79_v1 = vld [vmem:[#allocation2 + $0x8] sm:$0xff]  ;;  %s348_s8 = smov [#allocation7]  }
  0x2a   :  { %v94_v2 = vld [vmem:[#allocation5] sm:$0xff]  ;;  %v95_v3 = vld [vmem:[#allocation5 + $0x8] sm:$0xff]  ;;  %s252_s9 = sshll.u32 %s348_s8, 4  ;;  %s253_s9 = int_to_ptr.vmem [resolvable:$true] %s252_s9 }
  0x2b   :  { %v110_v4 = vsub.f32 %v78_v0, %v94_v2  ;;  %v111_v5 = vsub.f32 %v79_v1, %v95_v3  ;;  %s316_s1 = scalar_lea.vmem %s253_s9, 128  ;;  %p321_p3 = scmp.lt.s32.totalorder %s253_s9, %s253_s9 }
  0x2c   :  { %p317_p2 = scmp.ne.s32.totalorder %s253_s9, %s316_s1  ;;  %p322_p4 = scmp.lt.s32.totalorder %s316_s1, %s316_s1 }
  0x2d   :  { %v126_v6 = vand.u32 2147483647, %v110_v4  ;;  %v127_v7 = vand.u32 2147483647, %v111_v5 }
  0x2e   :  { %p323_p5 = por %p322_p4, %p321_p3 }
  0x2f   :  { %v142_v8 = vmul.f32 %v126_v6, %v126_v6  ;;  %v143_v9 = vmul.f32 %v127_v7, %v127_v7 }
  0x30   :  { %p324_p6 = pnand %p323_p5, %p317_p2 }
  0x31   :  { %v158_v10 = vadd.f32 %v142_v8, %v126_v6  ;;  %v159_v11 = vadd.f32 %v143_v9, %v127_v7 }
  0x33   :  { %v227_v12 = vadd.f32 %v159_v11, %v158_v10 }
  0x35   :  { %245 = vst [vmem:[#allocation7] sm:$0xff] %v227_v12 }
  0x36   :  { %327 = shalt.err (!%p324_p6)
}
  0x37   :  { %s328_s12 = scalar_lea.hbm %s402_s2, 128 }
  0x38   :  { %p329_p7 = scmp.ne.s32.totalorder %s402_s2, %s328_s12  ;;  %p332_p8 = scmp.lt.u32.totalorder %s328_s12, %s402_s2 }
  0x3a   :  { %p334_p9 = pnand %p332_p8, %p329_p7 }
  0x3c   :  { %337 = shalt.err (!%p334_p9)
}
  0x3d   :  { %255 = dma.vmem_to_hbm [thread:$0]  %s253_s9, 128, %s402_s2, [#allocation4]  }
  0x3e   :  { %342 = dma.done.wait [#allocation4], 128  }
  0x3f   :  { %343 = vsyncadd [#allocation4], 4294967168 }
  0x40   :  { %259 = vsyncpa [#allocation3], 1 }
  0x41   :  { %260 = vsyncpa [#allocation6], 1 }
  0x42   :  { %261 = vsyncpa [#allocation4], 1 }

</bundles_post_ra>
